<compile_context>
chip_gen: v7x
topology: tpu7x:2x2x1
jax: 0.10.0
libtpu: 0.0.40
codegen_flags: <defaults>
</compile_context>

<pallas_src>
import jax
import jax.numpy as jnp
from jax import lax
from jax.experimental import pallas as pl
from jax.experimental.pallas import tpu as pltpu


# ------------------------------ helpers ------------------------------------

def _round_up(v, m):
    return ((v + m - 1) // m) * m


def _pick_row_tile(n_rows, cols, row_bytes, fixed_bytes,
                   budget_bytes=40 * 1024 * 1024, target_elems=2048):
    """Rows per grid step: ~target_elems of rows*cols, VMEM-budgeted, and at
    least 2 grid steps when possible (keeps both v7x TensorCores busy)."""
    tr = max(1, min(n_rows, max(1, target_elems // max(cols, 1))))
    while tr > 1 and fixed_bytes + tr * row_bytes > budget_bytes:
        tr = max(1, tr // 2)
    if n_rows >= 2:
        tr = min(tr, -(-n_rows // 2))          # guarantee grid >= 2
    if cols % 8 and tr > 8:
        tr -= tr % 8                           # keep tr*cols sublane friendly
    return max(1, tr)


# ----------------------------- Pallas kernels -------------------------------

def _conv_kernel(v0_ref, v1_ref, v2_ref, w_ref, b_ref, o_ref):
    # v*_ref : (TR, Jp, 2C) bf16 column-pair views for padded rows ky = 0,1,2
    # w_ref  : (6, 2C, Npad) bf16 -- per ky: [W(ky,0);W(ky,1)] and [W(ky,2);0]
    # b_ref  : (1, Npad) f32 bias, o_ref: (TR, Wo, Npad) output tile
    TR, Wo, Npad = o_ref.shape
    C2 = w_ref.shape[1]

    acc = None                                    # local f32 accumulator
    for ky, v_ref in enumerate((v0_ref, v1_ref, v2_ref)):
        xk = v_ref[...]                           # (TR, Jp, 2C)
        main = xk[:, :Wo, :].reshape(TR * Wo, C2)         # pairs j = ow
        shft = xk[:, 1:Wo + 1, :].reshape(TR * Wo, C2)    # pairs j = ow + 1
        part = jnp.dot(main, w_ref[2 * ky],
                       preferred_element_type=jnp.float32)
        part = part + jnp.dot(shft, w_ref[2 * ky + 1],
                              preferred_element_type=jnp.float32)
        acc = part if acc is None else acc + part

    # bias added exactly once, single store of the tile
    o_ref[...] = (acc + b_ref[...]).reshape(TR, Wo, Npad).astype(o_ref.dtype)


def _avgpool_kernel(x_ref, p_ref, o_ref):
    # x_ref: (TRg, k*4*Wo) -- k pooled rows packed into lanes, each carrying
    # its two source image rows back-to-back.  p_ref: block-diagonal 0.25
    # selection matrix.  Single MXU dot -> lane-dense (TRg, k*Wo) output.
    o_ref[...] = jnp.dot(x_ref[...].astype(jnp.float32), p_ref[...],
                         preferred_element_type=jnp.float32).astype(o_ref.dtype)


# ------------------------------- wrappers -----------------------------------

def downsample_conv(x, weight, bias):
    """Conv2d(C, C, kernel_size=3, stride=2, padding=1) forward.

    x: (B, C, H, W), weight: (Cout, Cin, 3, 3) [PyTorch OIHW], bias: (Cout,)
    returns: (B, Cout, Ho, Wo).
    """
    B, C, H, W = x.shape
    Cout = weight.shape[0]
    Ho = (H + 2 - 3) // 2 + 1
    Wo = (W + 2 - 3) // 2 + 1
    Npad = _round_up(max(Cout, 128), 128)          # lane-dense output channels
    C2 = 2 * C
    Hp = 2 * Ho + 1                                # exactly the rows needed
    Wp = 2 * Wo + 2                                # even, exactly cols needed
    Jp = Wp // 2

    # ---- glue: bf16 cast (halves HBM traffic), NHWC, pad, 3 row views ------
    xb = x.astype(jnp.bfloat16)
    xh = jnp.transpose(xb, (0, 2, 3, 1))                         # (B, H, W, C)
    xp = jnp.pad(xh, ((0, 0), (1, Hp - H - 1), (1, Wp - W - 1), (0, 0)))

    views = []
    for ky in range(3):
        rows = xp[:, ky:ky + 2 * Ho - 1:2, :, :]                 # (B, Ho, Wp, C)
        # free reshape: split cols into (pair, parity), merge parity w/ channels
        views.append(rows.reshape(B * Ho, Jp, C2))               # (R, Jp, 2C)

    # ---- weights: per ky a [kx=0|kx=1] slab and a [kx=2|zeros] slab --------
    wf = weight.astype(jnp.float32)
    slabs = []
    for ky in range(3):
        wa = wf[:, :, ky, 0:2].transpose(2, 1, 0).reshape(C2, Cout)
        wb = jnp.concatenate(
            [wf[:, :, ky, 2].T, jnp.zeros((C, Cout), jnp.float32)], axis=0)
        slabs += [wa, wb]
    Wm = jnp.stack(slabs, axis=0)                                 # (6, 2C, Cout)
    Wm = jnp.pad(Wm, ((0, 0), (0, 0), (0, Npad - Cout))).astype(jnp.bfloat16)
    b2 = jnp.pad(bias.astype(jnp.float32), (0, Npad - Cout)).reshape(1, Npad)

    # ---- tiling over output rows (VMEM-budgeted, >=2 grid steps) -----------
    R = B * Ho
    row_bytes = 2 * (3 * Jp * C2 * 2) + 2 * (Wo * Npad * 4)   # dbl-buffered io
    fixed_bytes = 6 * C2 * Npad * 2 + Npad * 4 + (1 << 20)    # weights + slack
    TR = _pick_row_tile(R, Wo, row_bytes, fixed_bytes)
    Rp = _round_up(R, TR)
    if Rp != R:
        views = [jnp.pad(v, ((0, Rp - R), (0, 0), (0, 0))) for v in views]
    grid = (Rp // TR,)

    vspec = pl.BlockSpec((TR, Jp, C2), lambda i: (i, 0, 0))
    in_specs = [vspec, vspec, vspec,
                pl.BlockSpec((6, C2, Npad), lambda i: (0, 0, 0)),  # resident
                pl.BlockSpec((1, Npad), lambda i: (0, 0))]         # resident
    # TODO(synk): pipeline_mode=pl.Buffered(1) on the two resident operands
    # would drop their second pipeline buffer (matters only at large C).

    est_vmem = fixed_bytes + TR * row_bytes
    vmem_limit = int(min(48 * 2 ** 20, max(32 * 2 ** 20, 2 * est_vmem)))

    flops = 2 * Rp * Wo * (6 * C2) * Npad + Rp * Wo * Npad
    bytes_accessed = int(3 * Rp * Jp * C2 * 2 + 6 * C2 * Npad * 2
                         + Npad * 4 + Rp * Wo * Npad * 4)

    out = pl.pallas_call(
        _conv_kernel,
        out_shape=jax.ShapeDtypeStruct((Rp, Wo, Npad), x.dtype),
        grid_spec=pltpu.PrefetchScalarGridSpec(
            num_scalar_prefetch=0,
            grid=grid,
            in_specs=in_specs,
            out_specs=pl.BlockSpec((TR, Wo, Npad), lambda i: (i, 0, 0)),
        ),
        compiler_params=pltpu.CompilerParams(
            dimension_semantics=("parallel",),      # row tiles independent
            vmem_limit_bytes=vmem_limit,
        ),
        cost_estimate=pl.CostEstimate(flops=flops, transcendentals=0,
                                      bytes_accessed=bytes_accessed),
    )(views[0], views[1], views[2], Wm, b2)

    # (Rp, Wo, Npad) -> (B, Cout, Ho, Wo)   (NCHW transpose is host glue)
    return out[:R, :, :Cout].reshape(B, Ho, Wo, Cout).transpose(0, 3, 1, 2)


def downsample_avgpool(x):
    """AvgPool2d(kernel_size=2, stride=2) forward (use_conv=False branch)."""
    B, C, H, W = x.shape
    Ho, Wo = H // 2, W // 2
    R = B * C * Ho
    L = 4 * Wo                                    # two source rows per pooled row

    xf = x[:, :, :2 * Ho, :2 * Wo].reshape(R, L)  # free reshape for even H, W

    # pack k pooled rows per kernel row so the output is lane-dense (>=128 lanes)
    k = max(1, min(R, 128 // max(Wo, 1)))
    Rg = -(-R // k)

    cols = jnp.arange(L)[:, None]
    sel = ((cols % (2 * Wo)) // 2) == jnp.arange(Wo)[None, :]
    p0 = 0.25 * sel.astype(jnp.float32)                       # (L, Wo)
    P = jnp.kron(jnp.eye(k, dtype=jnp.float32), p0)           # (k*L, k*Wo)

    itemsize = jnp.dtype(x.dtype).itemsize
    row_bytes = 2 * (k * L * itemsize) + 2 * (k * Wo * itemsize)
    if Rg < 16:
        TRg, Rgp = Rg, Rg                         # single full-extent block
    else:
        TRg = 256
        while TRg > 8 and (TRg * row_bytes > 8 * 2 ** 20 or -(-Rg // TRg) < 2):
            TRg //= 2
        TRg = max(8, TRg)
        Rgp = _round_up(Rg, TRg)

    pad_rows = Rgp * k - R
    if pad_rows:
        xf = jnp.pad(xf, ((0, pad_rows), (0, 0)))
    xg = xf.reshape(Rgp, k * L)

    out = pl.pallas_call(
        _avgpool_kernel,
        out_shape=jax.ShapeDtypeStruct((Rgp, k * Wo), x.dtype),
        grid_spec=pltpu.PrefetchScalarGridSpec(
            num_scalar_prefetch=0,
            grid=(Rgp // TRg,),
            in_specs=[pl.BlockSpec((TRg, k * L), lambda i: (i, 0)),
                      pl.BlockSpec((k * L, k * Wo), lambda i: (0, 0))],
            out_specs=pl.BlockSpec((TRg, k * Wo), lambda i: (i, 0)),
        ),
        compiler_params=pltpu.CompilerParams(
            dimension_semantics=("parallel",),
            vmem_limit_bytes=32 * 1024 * 1024,
        ),
    )(xg, P)

    return out.reshape(Rgp * k, Wo)[:R].reshape(B, C, Ho, Wo)


def downsample(x, weight, bias, use_conv=True):
    if use_conv:
        return downsample_conv(x, weight, bias)
    return downsample_avgpool(x)


# --------------------------------- main --------------------------------------

if __name__ == "__main__":
    key = jax.random.PRNGKey(0)
    kx, kw, kb = jax.random.split(key, 3)

    B, C, H, W = 2, 4, 16, 16
    x = jax.random.normal(kx, (B, C, H, W), dtype=jnp.float32)

    # deterministic parameter init (Conv2d(C, C, 3, 3) shapes)
    fan_in = C * 3 * 3
    bound = 1.0 / (fan_in ** 0.5)
    weight = jax.random.uniform(kw, (C, C, 3, 3), jnp.float32, -bound, bound)
    bias = jax.random.uniform(kb, (C,), jnp.float32, -bound, bound)

    ds = jax.jit(downsample, static_argnames=("use_conv",))

    # ---- conv branch (use_conv=True) ----
    out = jax.block_until_ready(ds(x, weight, bias, use_conv=True))
    assert out.shape == (B, C, H // 2, W // 2), out.shape

    # Kernel feeds the MXU bf16 operands with f32 accumulation; compare against
    # a reference whose inputs are identically bf16-rounded (products exact).
    xr = x.astype(jnp.bfloat16).astype(jnp.float32)
    wr = weight.astype(jnp.bfloat16).astype(jnp.float32)
    ref = lax.conv_general_dilated(
        xr, wr, window_strides=(2, 2), padding=((1, 1), (1, 1)),
        dimension_numbers=("NCHW", "OIHW", "NCHW"),
    ) + bias.reshape(1, C, 1, 1)
    assert jnp.allclose(out, ref, rtol=1e-3, atol=1e-3), \
        float(jnp.max(jnp.abs(out - ref)))

    # ---- avgpool branch (use_conv=False) ----
    out_pool = jax.block_until_ready(ds(x, weight, bias, use_conv=False))
    ref_pool = x.reshape(B, C, H // 2, 2, W // 2, 2).mean(axis=(3, 5))
    assert jnp.allclose(out_pool, ref_pool, rtol=1e-5, atol=1e-5)

    print("KERNEL_OK")
</pallas_src>

<mosaic_0001>
module attributes {stable_mosaic.version = 11 : i64} {
  func.func @_conv_kernel(%arg0: i32, %arg1: memref<8x9x8xbf16, #tpu.memory_space<vmem>>, %arg2: memref<8x9x8xbf16, #tpu.memory_space<vmem>>, %arg3: memref<8x9x8xbf16, #tpu.memory_space<vmem>>, %arg4: memref<6x8x128xbf16, #tpu.memory_space<vmem>>, %arg5: memref<1x128xf32, #tpu.memory_space<vmem>>, %arg6: memref<8x8x128xf32, #tpu.memory_space<vmem>>) attributes {dimension_semantics = [#tpu.dimension_semantics<parallel>], iteration_bounds = array<i64: 2>, scalar_prefetch = 0 : i64, scratch_operands = 0 : i64, tpu.core_type = #tpu.core_type<tc>, window_params = [{transform_indices = @transform_0, window_bounds = array<i64: 8, 9, 8>}, {transform_indices = @transform_1, window_bounds = array<i64: 8, 9, 8>}, {transform_indices = @transform_2, window_bounds = array<i64: 8, 9, 8>}, {pipeline_mode = #tpu.pipeline_mode<synchronous>, transform_indices = @transform_3, window_bounds = array<i64: 6, 8, 128>}, {pipeline_mode = #tpu.pipeline_mode<synchronous>, transform_indices = @transform_4, window_bounds = array<i64: 1, 128>}, {transform_indices = @transform_5, window_bounds = array<i64: 8, 8, 128>}]} {
    %c0 = arith.constant 0 : index
    %c0_0 = arith.constant 0 : index
    %c0_1 = arith.constant 0 : index
    %0 = vector.load %arg1[%c0, %c0_0, %c0_1] : memref<8x9x8xbf16, #tpu.memory_space<vmem>>, vector<8x9x8xbf16>
    %1 = vector.extract_strided_slice %0 {offsets = [0, 0, 0], sizes = [8, 8, 8], strides = [1, 1, 1]} : vector<8x9x8xbf16> to vector<8x8x8xbf16>
    %2 = vector.shape_cast %1 : vector<8x8x8xbf16> to vector<64x8xbf16>
    %3 = vector.extract_strided_slice %0 {offsets = [0, 1, 0], sizes = [8, 8, 8], strides = [1, 1, 1]} : vector<8x9x8xbf16> to vector<8x8x8xbf16>
    %4 = vector.shape_cast %3 : vector<8x8x8xbf16> to vector<64x8xbf16>
    %c0_2 = arith.constant 0 : index
    %c0_3 = arith.constant 0 : index
    %c0_4 = arith.constant 0 : index
    %5 = vector.load %arg4[%c0_2, %c0_3, %c0_4] : memref<6x8x128xbf16, #tpu.memory_space<vmem>>, vector<1x8x128xbf16>
    %6 = vector.shape_cast %5 : vector<1x8x128xbf16> to vector<8x128xbf16>
    %cst = arith.constant dense<0.000000e+00> : vector<64x128xf32>
    %7 = tpu.matmul %2, %6, %cst {dimension_numbers = #tpu.dot_dimension_numbers<[1], [0], [0], [1], [0, 0, 1, 1], [], []>} : vector<64x8xbf16>, vector<8x128xbf16>, vector<64x128xf32> -> vector<64x128xf32>
    %c1 = arith.constant 1 : index
    %c0_5 = arith.constant 0 : index
    %c0_6 = arith.constant 0 : index
    %8 = vector.load %arg4[%c1, %c0_5, %c0_6] : memref<6x8x128xbf16, #tpu.memory_space<vmem>>, vector<1x8x128xbf16>
    %9 = vector.shape_cast %8 : vector<1x8x128xbf16> to vector<8x128xbf16>
    %cst_7 = arith.constant dense<0.000000e+00> : vector<64x128xf32>
    %10 = tpu.matmul %4, %9, %cst_7 {dimension_numbers = #tpu.dot_dimension_numbers<[1], [0], [0], [1], [0, 0, 1, 1], [], []>} : vector<64x8xbf16>, vector<8x128xbf16>, vector<64x128xf32> -> vector<64x128xf32>
    %11 = arith.addf %7, %10 : vector<64x128xf32>
    %c0_8 = arith.constant 0 : index
    %c0_9 = arith.constant 0 : index
    %c0_10 = arith.constant 0 : index
    %12 = vector.load %arg2[%c0_8, %c0_9, %c0_10] : memref<8x9x8xbf16, #tpu.memory_space<vmem>>, vector<8x9x8xbf16>
    %13 = vector.extract_strided_slice %12 {offsets = [0, 0, 0], sizes = [8, 8, 8], strides = [1, 1, 1]} : vector<8x9x8xbf16> to vector<8x8x8xbf16>
    %14 = vector.shape_cast %13 : vector<8x8x8xbf16> to vector<64x8xbf16>
    %15 = vector.extract_strided_slice %12 {offsets = [0, 1, 0], sizes = [8, 8, 8], strides = [1, 1, 1]} : vector<8x9x8xbf16> to vector<8x8x8xbf16>
    %16 = vector.shape_cast %15 : vector<8x8x8xbf16> to vector<64x8xbf16>
    %c2 = arith.constant 2 : index
    %c0_11 = arith.constant 0 : index
    %c0_12 = arith.constant 0 : index
    %17 = vector.load %arg4[%c2, %c0_11, %c0_12] : memref<6x8x128xbf16, #tpu.memory_space<vmem>>, vector<1x8x128xbf16>
    %18 = vector.shape_cast %17 : vector<1x8x128xbf16> to vector<8x128xbf16>
    %cst_13 = arith.constant dense<0.000000e+00> : vector<64x128xf32>
    %19 = tpu.matmul %14, %18, %cst_13 {dimension_numbers = #tpu.dot_dimension_numbers<[1], [0], [0], [1], [0, 0, 1, 1], [], []>} : vector<64x8xbf16>, vector<8x128xbf16>, vector<64x128xf32> -> vector<64x128xf32>
    %c3 = arith.constant 3 : index
    %c0_14 = arith.constant 0 : index
    %c0_15 = arith.constant 0 : index
    %20 = vector.load %arg4[%c3, %c0_14, %c0_15] : memref<6x8x128xbf16, #tpu.memory_space<vmem>>, vector<1x8x128xbf16>
    %21 = vector.shape_cast %20 : vector<1x8x128xbf16> to vector<8x128xbf16>
    %cst_16 = arith.constant dense<0.000000e+00> : vector<64x128xf32>
    %22 = tpu.matmul %16, %21, %cst_16 {dimension_numbers = #tpu.dot_dimension_numbers<[1], [0], [0], [1], [0, 0, 1, 1], [], []>} : vector<64x8xbf16>, vector<8x128xbf16>, vector<64x128xf32> -> vector<64x128xf32>
    %23 = arith.addf %19, %22 : vector<64x128xf32>
    %24 = arith.addf %11, %23 : vector<64x128xf32>
    %c0_17 = arith.constant 0 : index
    %c0_18 = arith.constant 0 : index
    %c0_19 = arith.constant 0 : index
    %25 = vector.load %arg3[%c0_17, %c0_18, %c0_19] : memref<8x9x8xbf16, #tpu.memory_space<vmem>>, vector<8x9x8xbf16>
    %26 = vector.extract_strided_slice %25 {offsets = [0, 0, 0], sizes = [8, 8, 8], strides = [1, 1, 1]} : vector<8x9x8xbf16> to vector<8x8x8xbf16>
    %27 = vector.shape_cast %26 : vector<8x8x8xbf16> to vector<64x8xbf16>
    %28 = vector.extract_strided_slice %25 {offsets = [0, 1, 0], sizes = [8, 8, 8], strides = [1, 1, 1]} : vector<8x9x8xbf16> to vector<8x8x8xbf16>
    %29 = vector.shape_cast %28 : vector<8x8x8xbf16> to vector<64x8xbf16>
    %c4 = arith.constant 4 : index
    %c0_20 = arith.constant 0 : index
    %c0_21 = arith.constant 0 : index
    %30 = vector.load %arg4[%c4, %c0_20, %c0_21] : memref<6x8x128xbf16, #tpu.memory_space<vmem>>, vector<1x8x128xbf16>
    %31 = vector.shape_cast %30 : vector<1x8x128xbf16> to vector<8x128xbf16>
    %cst_22 = arith.constant dense<0.000000e+00> : vector<64x128xf32>
    %32 = tpu.matmul %27, %31, %cst_22 {dimension_numbers = #tpu.dot_dimension_numbers<[1], [0], [0], [1], [0, 0, 1, 1], [], []>} : vector<64x8xbf16>, vector<8x128xbf16>, vector<64x128xf32> -> vector<64x128xf32>
    %c5 = arith.constant 5 : index
    %c0_23 = arith.constant 0 : index
    %c0_24 = arith.constant 0 : index
    %33 = vector.load %arg4[%c5, %c0_23, %c0_24] : memref<6x8x128xbf16, #tpu.memory_space<vmem>>, vector<1x8x128xbf16>
    %34 = vector.shape_cast %33 : vector<1x8x128xbf16> to vector<8x128xbf16>
    %cst_25 = arith.constant dense<0.000000e+00> : vector<64x128xf32>
    %35 = tpu.matmul %29, %34, %cst_25 {dimension_numbers = #tpu.dot_dimension_numbers<[1], [0], [0], [1], [0, 0, 1, 1], [], []>} : vector<64x8xbf16>, vector<8x128xbf16>, vector<64x128xf32> -> vector<64x128xf32>
    %36 = arith.addf %32, %35 : vector<64x128xf32>
    %37 = arith.addf %24, %36 : vector<64x128xf32>
    %c0_26 = arith.constant 0 : index
    %c0_27 = arith.constant 0 : index
    %38 = vector.load %arg5[%c0_26, %c0_27] : memref<1x128xf32, #tpu.memory_space<vmem>>, vector<1x128xf32>
    %39 = vector.broadcast %38 : vector<1x128xf32> to vector<64x128xf32>
    %40 = arith.addf %37, %39 : vector<64x128xf32>
    %41 = vector.shape_cast %40 : vector<64x128xf32> to vector<8x8x128xf32>
    %c0_28 = arith.constant 0 : index
    %c0_29 = arith.constant 0 : index
    %c0_30 = arith.constant 0 : index
    %42 = vector.load %arg6[%c0_28, %c0_29, %c0_30] : memref<8x8x128xf32, #tpu.memory_space<vmem>>, vector<8x8x128xf32>
    tpu.vector_store %arg6[%c0_28, %c0_29, %c0_30], %41 {strides = array<i32>} : memref<8x8x128xf32, #tpu.memory_space<vmem>>, vector<8x8x128xf32>,
    return
  }
  func.func @transform_0(%arg0: i32) -> (i32, i32, i32) {
    %c0_i32 = arith.constant 0 : i32
    %c0_i32_0 = arith.constant 0 : i32
    %c0_i32_1 = arith.constant 0 : i32
    return %arg0, %c0_i32, %c0_i32_0 : i32, i32, i32
  }
  func.func @transform_1(%arg0: i32) -> (i32, i32, i32) {
    %c0_i32 = arith.constant 0 : i32
    %c0_i32_0 = arith.constant 0 : i32
    %c0_i32_1 = arith.constant 0 : i32
    return %arg0, %c0_i32, %c0_i32_0 : i32, i32, i32
  }
  func.func @transform_2(%arg0: i32) -> (i32, i32, i32) {
    %c0_i32 = arith.constant 0 : i32
    %c0_i32_0 = arith.constant 0 : i32
    %c0_i32_1 = arith.constant 0 : i32
    return %arg0, %c0_i32, %c0_i32_0 : i32, i32, i32
  }
  func.func @transform_3(%arg0: i32) -> (i32, i32, i32) {
    %c0_i32 = arith.constant 0 : i32
    %c0_i32_0 = arith.constant 0 : i32
    %c0_i32_1 = arith.constant 0 : i32
    %c0_i32_2 = arith.constant 0 : i32
    return %c0_i32, %c0_i32_0, %c0_i32_1 : i32, i32, i32
  }
  func.func @transform_4(%arg0: i32) -> (i32, i32) {
    %c0_i32 = arith.constant 0 : i32
    %c0_i32_0 = arith.constant 0 : i32
    %c0_i32_1 = arith.constant 0 : i32
    return %c0_i32, %c0_i32_0 : i32, i32
  }
  func.func @transform_5(%arg0: i32) -> (i32, i32, i32) {
    %c0_i32 = arith.constant 0 : i32
    %c0_i32_0 = arith.constant 0 : i32
    %c0_i32_1 = arith.constant 0 : i32
    return %arg0, %c0_i32, %c0_i32_0 : i32, i32, i32
  }
}

</mosaic_0001>

<bundles_post_ra>
// kernel: downsample.1
= control target key start
LH: loop header
LB: loop body
LE: loop exit
PB: predicated region body
PF: predicated region fallthrough
CT: control target
= control target key end

     0   :  { %s1646_s18 = smov 0   ;;  %s2000_s0 = inlined_call_operand.vmem [shape: bf16[16,9,8], index: 0, kind: input, shape index: {}]   ;;  %s2001_s1 = inlined_call_operand.vmem [shape: bf16[16,9,8], index: 1, kind: input, shape index: {}]   ;;  %s2002_s2 = inlined_call_operand.vmem [shape: bf16[16,9,8], index: 2, kind: input, shape index: {}]   ;;  %s2003_s3 = inlined_call_operand.vmem [shape: bf16[6,8,128], index: 3, kind: input, shape index: {}]   ;;  %s2004_s4 = inlined_call_operand.vmem [shape: f32[1,128], index: 4, kind: input, shape index: {}]   ;;  %s2005_s5 = inlined_call_operand.vmem [shape: f32[16,8,128], index: 5, kind: output, shape index: {}]  }
   0x1 LB: > { %s1377_s19 = sadd.s32 4294967295, %s1614_s18   ;;  %p1381_p0 = scmp.ge.s32.totalorder %s1614_s18, 1  ;;  %s1614_s18 = sphi %s1646_s18, %s15_s18  }
   0x2   : > { %p213_p1 = scmp.lt.s32.totalorder %s1614_s18, 3 }
   0x4   : > { %p214_p2 = pnand %p1381_p0, %p213_p1 }
   0x5   : > { %vm441_vm0 = vcmask (!%p214_p2), 1043456   ;;  %v1410_v0 = vld [vmem:[%s2003_s3 + $0x8] sm:$0xf] (!%p214_p2)  ;;  %s1382_s22 = sshll.u32 (!%p214_p2), %s1377_s19, 3  ;;  %v1393_v2 = vld [vmem:[%s2003_s3 + $0x4] sm:$0xf] (!%p214_p2) }
   0x6   : > { %217 = sbr.rel (%p214_p2) target bundleno = 311 (0x137), region = 40  ;;  %1585 = vmatprep.subr.msk.bf16.mxu0 (!%p214_p2), %vm441_vm0, %v1410_v0  ;;  %v867_v1 = vsel (!%p214_p2), %vm441_vm0, %v1410_v0, 0  ;;  %p255_p3 = scmp.lt.s32.totalorder (!%p214_p2), %s1382_s22, 15  ;;  %1582 = vmatprep.subr.msk.bf16.mxu1 (!%p214_p2), %vm441_vm0, %v1393_v2  ;;  %v443_v3 = vsel (!%p214_p2), %vm441_vm0, %v1393_v2, 0  ;;  %v413_v4 = vld [vmem:[%s2003_s3] sm:$0xf] (!%p214_p2) }
   0x7   : > { %1513 = vmatpush3.bf16.msra.mxu0 (!%p214_p2), %v867_v1  ;;  %1483 = vmatpush3.bf16.msra.mxu1 (!%p214_p2), %v443_v3  ;;  %v1429_v5 = vld [vmem:[%s2003_s3 + $0x14] sm:$0xf] (!%p214_p2)  ;;  %vm428_vm1 = vcmask (!%p214_p2), 64512   ;;  %v1689_v11 = vld [vmem:[%s2003_s3 + $0xc] sm:$0xf] (!%p214_p2)  ;;  %v1699_v14 = vsel (!%p214_p2), %vm441_vm0, %v413_v4, 0 }
   0x8   : > { %1583 = vmatprep.subr.msk.bf16.mxu1 (!%p214_p2), %vm441_vm0, %v413_v4  ;;  %1586 = vmatprep.subr.msk.bf16.mxu0 (!%p214_p2), %vm441_vm0, %v1429_v5  ;;  %vm298_vm2 = vsmask.f32 (!%p214_p2), 3328  ;;  %vm299_vm3 = vsmask.f32 (!%p214_p2), 7440  ;;  %v1099_v15 = vsel (!%p214_p2), %vm441_vm0, %v1429_v5, 0  ;;  %v1708_v20 = vsel (!%p214_p2), %vm441_vm0, %v1689_v11, 0 }
   0x9   : > { %v1428_v16 = vld [vmem:[%s2003_s3 + $0x10] sm:$0xf] (!%p214_p2)  ;;  %vm1777_vm4 = vmor (!%p214_p2), %vm298_vm2, %vm299_vm3 }
   0xa   : > { %v1725_v27 = vsel (!%p214_p2), %vm441_vm0, %v1428_v16, 0 }
   0xd   : > { %s2009_s22 = smov (!%p255_p3, %s1382_s22), 15 }
   0xe   : > { %s1672_s29 = sshll.u32 %s2009_s22, 3 }
   0xf   : > { %s1678_s7 = scalar_lea.vmem %s2001_s1, %s1672_s29  ;;  %s1695_s12 = scalar_lea.vmem %s2000_s0, %s1672_s29 }
  0x10   : > { %v610_v6 = vld [vmem:[%s1678_s7] sm:$0xf]  ;;  %v612_v7 = vld [vmem:[%s1678_s7 + $0x8] sm:$0xf]  ;;  %v614_v9 = vld [vmem:[%s1678_s7 + $0x10] sm:$0xf]  ;;  %s1757_s17 = scalar_lea.vmem %s2002_s2, %s1672_s29  ;;  %s1987_s23 = scalar_lea.vmem %s2005_s5, %s1672_s29 }
  0x11   : > { %v1420_v8 = vcombine.low %v610_v6, %v612_v7  ;;  %v1684_v10 = vld [vmem:[%s1678_s7 + $0x18] sm:$0xf]  ;;  %v627_v12 = vshrl.u32 %v610_v6, 16  ;;  %v630_v13 = vshll.u32 %v610_v6, 16  ;;  %v641_v17 = vshrl.u32 %v612_v7, 16 }
  0x12   : > { %v644_v18 = vshll.u32 %v612_v7, 16  ;;  %v1421_v19 = vcombine.low %v614_v9, %v1684_v10  ;;  %v1711_v21 = vld [vmem:[%s1678_s7 + $0x20] sm:$0xf]  ;;  %v1714_v22 = vld [vmem:[%s1678_s7 + $0x28] sm:$0xf]  ;;  %v655_v24 = vshrl.u32 %v614_v9, 16 }
  0x13   : > { %1514 = vmatprep.mubr.msk.bf16.mxu0 %vm428_vm1, %v1420_v8  ;;  %v1717_v23 = vld [vmem:[%s1695_s12] sm:$0xf]  ;;  %v283_v25 = vld [vmem:[%s1695_s12 + $0x4] sm:$0x1]  ;;  %v1722_v26 = vld [vmem:[%s1695_s12 + $0x8] sm:$0xf]  ;;  %v1422_v34 = vcombine.low %v1711_v21, %v1714_v22 }
  0x14   : > { %1515 = vmatmul.mubr.msk.bf16.vlgmr.msra.gmra.mrb[0].mxu0 %vm428_vm1, %v1421_v19  ;;  %v1727_v28 = vrot.slane %v627_v12, 4  ;;  %v1729_v29 = vrot.slane %v630_v13, 5  ;;  %v658_v30 = vshll.u32 %v614_v9, 16  ;;  %v669_v31 = vshrl.u32 %v1684_v10, 16  ;;  %v285_v32 = vld [vmem:[%s1695_s12 + $0xc] sm:$0x1] }
  0x15   : > { %1523 = vmatpush3.bf16.msra.mxu0 %v1099_v15  ;;  %v1733_v33 = vrot.slane %v641_v17, 4  ;;  %v302_v35 = vshrl.u32 %v1717_v23, 16  ;;  %v305_v36 = vshll.u32 %v1717_v23, 16  ;;  %v1740_v37 = vrot.slane %v644_v18, 5  ;;  %v1745_v41 = vld [vmem:[%s1678_s7 + $0x30] sm:$0xf]  ;;  %1518 = vmatprep.mubr.msk.bf16.mxu0 %vm428_vm1, %v1422_v34 }
  0x16   : > { %1587 = vmatprep.subr.msk.bf16.mxu0 %vm441_vm0, %v1428_v16  ;;  %v311_v38 = vshll.u32 %v283_v25, 16  ;;  %v316_v39 = vshrl.u32 %v1722_v26, 16  ;;  %v319_v40 = vshll.u32 %v1722_v26, 16  ;;  %v1747_v42 = vrot.slane %v655_v24, 4  ;;  %v1751_v46 = vld [vmem:[%s1678_s7 + $0x38] sm:$0xf] }
  0x17   : > { %v304_v43 = vrot.slane %v302_v35, 4  ;;  %v307_v44 = vrot.slane %v305_v36, 5  ;;  %v325_v45 = vshll.u32 %v285_v32, 16  ;;  %v1759_v47 = vrot.slane %v658_v30, 5  ;;  %v1763_v51 = vld [vmem:[%s1695_s12 + $0x10] sm:$0xf] }
  0x18   : > { %v672_v48 = vshll.u32 %v1684_v10, 16  ;;  %v318_v49 = vrot.slane %v316_v39, 4  ;;  %v321_v50 = vrot.slane %v319_v40, 5  ;;  %v633_v52 = vor.u32 %v1729_v29, %v1727_v28  ;;  %v287_v56 = vld [vmem:[%s1695_s12 + $0x14] sm:$0x1] }
  0x19   : > { %v1767_v53 = vrot.slane %v669_v31, 4  ;;  %v308_v54 = vor.u32 %v307_v44, %v304_v43  ;;  %v313_v55 = vrot.slane %v311_v38, 5  ;;  %v1771_v57 = vld [vmem:[%s1695_s12 + $0x18] sm:$0xf]  ;;  %v647_v58 = vor.u32 %v1740_v37, %v1733_v33  ;;  %v289_v63 = vld [vmem:[%s1695_s12 + $0x1c] sm:$0x1] }
  0x1a   : > { %v322_v60 = vor.u32 %v321_v50, %v318_v49  ;;  %v327_v61 = vrot.slane %v325_v45, 5  ;;  %v1423_v62 = vcombine.low %v1745_v41, %v1751_v46  ;;  %v683_v0 = vshrl.u32 %v1711_v21, 16  ;;  %v1788_v4 = vld [vmem:[%s1757_s17] sm:$0xf]  ;;  %v943_v9 = vld [vmem:[%s1757_s17 + $0x4] sm:$0x1] }
  0x1b   : > { %v309_v1 = vrot.slane %v308_v54, 4  ;;  %v330_v2 = vshrl.u32 %v1763_v51, 16  ;;  %v333_v3 = vshll.u32 %v1763_v51, 16  ;;  %v1790_v5 = vrot.slane %v672_v48, 5  ;;  %v1799_v16 = vld [vmem:[%s1757_s17 + $0x8] sm:$0xf] }
  0x1c   : > { %v323_v6 = vrot.slane %v322_v60, 4  ;;  %1519 = vmatmul.mubr.msk.bf16.gmra.mrb[4].mxu0 %vm428_vm1, %v1423_v62  ;;  %v339_v7 = vshll.u32 %v287_v56, 16  ;;  %v344_v8 = vshrl.u32 %v1771_v57, 16  ;;  %v347_v15 = vshll.u32 %v1771_v57, 16  ;;  %v945_v32 = vld [vmem:[%s1757_s17 + $0xc] sm:$0x1] }
  0x1d   : > { %v314_v10 = vsel %vm1777_vm4, %v309_v1, %v313_v55  ;;  %v332_v12 = vrot.slane %v330_v2, 4  ;;  %v335_v13 = vrot.slane %v333_v3, 5  ;;  %v353_v24 = vshll.u32 %v289_v63, 16  ;;  %v1808_v40 = vld [vmem:[%s1695_s12 + $0x20] sm:$0xf] }
  0x1e   : > { %v328_v17 = vsel %vm1777_vm4, %v323_v6, %v327_v61  ;;  %v341_v18 = vrot.slane %v339_v7, 5  ;;  %v346_v19 = vrot.slane %v344_v8, 4  ;;  %v349_v31 = vrot.slane %v347_v15, 5  ;;  %v291_v49 = vld [vmem:[%s1695_s12 + $0x24] sm:$0x1] }
  0x1f   : > { %v1394_v25 = vcombine.low %v314_v10, %v328_v17  ;;  %v336_v30 = vor.u32 %v335_v13, %v332_v12  ;;  %v959_v34 = vshrl.u32 %v1788_v4, 16  ;;  %v355_v35 = vrot.slane %v353_v24, 5  ;;  %v1814_v60 = vld [vmem:[%s1695_s12 + $0x28] sm:$0xf]  ;;  %v293_v6 = vld [vmem:[%s1695_s12 + $0x2c] sm:$0x1] }
  0x20   : > { %v962_v36 = vshll.u32 %v1788_v4, 16  ;;  %v968_v38 = vshll.u32 %v943_v9, 16  ;;  %v973_v39 = vshrl.u32 %v1799_v16, 16  ;;  %v350_v44 = vor.u32 %v349_v31, %v346_v19  ;;  %v1825_v15 = vld [vmem:[%s1757_s17 + $0x10] sm:$0xf] }
  0x21   : > { %1484 = vmatprep.mubr.msk.bf16.mxu1 %vm428_vm1, %v1394_v25  ;;  %v337_v43 = vrot.slane %v336_v30, 4  ;;  %v961_v45 = vrot.slane %v959_v34, 4  ;;  %v976_v48 = vshll.u32 %v1799_v16, 16  ;;  %v982_v56 = vshll.u32 %v945_v32, 16  ;;  %v947_v25 = vld [vmem:[%s1757_s17 + $0x14] sm:$0x1] }
  0x22   : > { %v964_v50 = vrot.slane %v962_v36, 5  ;;  %v970_v54 = vrot.slane %v968_v38, 5  ;;  %v975_v55 = vrot.slane %v973_v39, 4  ;;  %v351_v62 = vrot.slane %v350_v44, 4  ;;  %v1833_v38 = vld [vmem:[%s1757_s17 + $0x18] sm:$0xf] }
  0x23   : > { %v342_v61 = vsel %vm1777_vm4, %v337_v43, %v341_v18  ;;  %v978_v63 = vrot.slane %v976_v48, 5  ;;  %v358_v1 = vshrl.u32 %v1808_v40, 16  ;;  %v984_v3 = vrot.slane %v982_v56, 5  ;;  %v949_v39 = vld [vmem:[%s1757_s17 + $0x1c] sm:$0x1] }
  0x24   : > { %v965_v2 = vor.u32 %v964_v50, %v961_v45  ;;  %v361_v7 = vshll.u32 %v1808_v40, 16  ;;  %v367_v8 = vshll.u32 %v291_v49, 16  ;;  %v356_v9 = vsel %vm1777_vm4, %v351_v62, %v355_v35 }
  0x25   : > { %v979_v10 = vor.u32 %v978_v63, %v975_v55  ;;  %v360_v12 = vrot.slane %v358_v1, 4  ;;  %v372_v13 = vshrl.u32 %v1814_v60, 16  ;;  %v1395_v17 = vcombine.low %v342_v61, %v356_v9  ;;  %v1842_v55 = vld [vmem:[%s1695_s12 + $0x30] sm:$0xf]  ;;  %v1853_v9 = vld [vmem:[%s1695_s12 + $0x38] sm:$0xf] }
  0x26   : > { %v966_v18 = vrot.slane %v965_v2, 4  ;;  %v363_v19 = vrot.slane %v361_v7, 5  ;;  %v369_v24 = vrot.slane %v367_v8, 5  ;;  %v375_v32 = vshll.u32 %v1814_v60, 16 }
  0x27   : > { %v980_v30 = vrot.slane %v979_v10, 4  ;;  %v374_v31 = vrot.slane %v372_v13, 4  ;;  %v381_v34 = vshll.u32 %v293_v6, 16  ;;  %1485 = vmatmul.mubr.msk.bf16.vlgmr.msra.gmra.mrb[0].mxu1 %vm428_vm1, %v1395_v17  ;;  %v987_v43 = vshrl.u32 %v1825_v15, 16 }
  0x28   : > { %v971_v35 = vsel %vm1777_vm4, %v966_v18, %v970_v54  ;;  %v364_v36 = vor.u32 %v363_v19, %v360_v12  ;;  %v990_v44 = vshll.u32 %v1825_v15, 16  ;;  %1493 = vmatpush3.bf16.msra.mxu1 %v1699_v14  ;;  %v377_v48 = vrot.slane %v375_v32, 5 }
  0x29   : > { %v985_v45 = vsel %vm1777_vm4, %v980_v30, %v984_v3  ;;  %v383_v49 = vrot.slane %v381_v34, 5  ;;  %v996_v50 = vshll.u32 %v947_v25, 16  ;;  %v989_v61 = vrot.slane %v987_v43, 4  ;;  %1584 = vmatprep.subr.msk.bf16.mxu1 %vm441_vm0, %v1689_v11  ;;  %v295_v3 = vld [vmem:[%s1695_s12 + $0x34] sm:$0x1] }
  0x2a   : > { %v1430_v54 = vcombine.low %v971_v35, %v985_v45  ;;  %v365_v56 = vrot.slane %v364_v36, 4  ;;  %v992_v62 = vrot.slane %v990_v44, 5  ;;  %v378_v63 = vor.u32 %v377_v48, %v374_v31  ;;  %v297_v25 = vld [vmem:[%s1695_s12 + $0x3c] sm:$0x1]  ;;  %v1862_v36 = vld [vmem:[%s1757_s17 + $0x20] sm:$0xf] }
  0x2b   : > { %v998_v1 = vrot.slane %v996_v50, 5  ;;  %v1001_v14 = vshrl.u32 %v1833_v38, 16  ;;  %v1004_v2 = vshll.u32 %v1833_v38, 16  ;;  %v1010_v8 = vshll.u32 %v949_v39, 16  ;;  %v951_v39 = vld [vmem:[%s1757_s17 + $0x24] sm:$0x1] }
  0x2c   : > { %1524 = vmatprep.mubr.msk.bf16.mxu0 %vm428_vm1, %v1430_v54  ;;  %v370_v6 = vsel %vm1777_vm4, %v365_v56, %v369_v24  ;;  %v993_v7 = vor.u32 %v992_v62, %v989_v61  ;;  %v386_v11 = vshrl.u32 %v1842_v55, 16  ;;  %v379_v10 = vrot.slane %v378_v63, 4  ;;  %v1869_v50 = vld [vmem:[%s1757_s17 + $0x28] sm:$0xf] }
  0x2d   : > { %v1003_v12 = vrot.slane %v1001_v14, 4  ;;  %v1006_v13 = vrot.slane %v1004_v2, 5  ;;  %v389_v17 = vshll.u32 %v1842_v55, 16  ;;  %v1012_v19 = vrot.slane %v1010_v8, 5 }
  0x2e   : > { %v994_v18 = vrot.slane %v993_v7, 4  ;;  %v388_v30 = vrot.slane %v386_v11, 4  ;;  %v395_v31 = vshll.u32 %v295_v3, 16  ;;  %v384_v24 = vsel %vm1777_vm4, %v379_v10, %v383_v49  ;;  %v953_v7 = vld [vmem:[%s1757_s17 + $0x2c] sm:$0x1] }
  0x2f   : > { %v1007_v32 = vor.u32 %v1006_v13, %v1003_v12  ;;  %v391_v34 = vrot.slane %v389_v17, 5  ;;  %v400_v35 = vshrl.u32 %v1853_v9, 16  ;;  %v1396_v43 = vcombine.low %v370_v6, %v384_v24  ;;  %v1879_v17 = vld [vmem:[%s1757_s17 + $0x30] sm:$0xf]  ;;  %v1886_v24 = vld [vmem:[%s1757_s17 + $0x38] sm:$0xf] }
  0x30   : > { %v999_v44 = vsel %vm1777_vm4, %v994_v18, %v998_v1  ;;  %v397_v45 = vrot.slane %v395_v31, 5  ;;  %v403_v48 = vshll.u32 %v1853_v9, 16  ;;  %v409_v61 = vshll.u32 %v297_v25, 16  ;;  %v955_v18 = vld [vmem:[%s1757_s17 + $0x34] sm:$0x1] }
  0x31   : > { %v1008_v54 = vrot.slane %v1007_v32, 4  ;;  %v392_v56 = vor.u32 %v391_v34, %v388_v30  ;;  %v402_v49 = vrot.slane %v400_v35, 4  ;;  %1488 = vmatprep.mubr.msk.bf16.mxu1 %vm428_vm1, %v1396_v43  ;;  %v1015_v63 = vshrl.u32 %v1862_v36, 16 }
  0x32   : > { %v405_v62 = vrot.slane %v403_v48, 5  ;;  %v1018_v14 = vshll.u32 %v1862_v36, 16  ;;  %v1024_v1 = vshll.u32 %v951_v39, 16  ;;  %v411_v6 = vrot.slane %v409_v61, 5  ;;  %v957_v61 = vld [vmem:[%s1757_s17 + $0x3c] sm:$0x1] }
  0x33   : > { %v1013_v2 = vsel %vm1777_vm4, %v1008_v54, %v1012_v19  ;;  %v393_v3 = vrot.slane %v392_v56, 4  ;;  %v1029_v8 = vshrl.u32 %v1869_v50, 16  ;;  %v1017_v12 = vrot.slane %v1015_v63, 4 }
  0x34   : > { %v1431_v11 = vcombine.low %v999_v44, %v1013_v2  ;;  %v406_v10 = vor.u32 %v405_v62, %v402_v49  ;;  %v1020_v13 = vrot.slane %v1018_v14, 5  ;;  %v1026_v30 = vrot.slane %v1024_v1, 5 }
  0x35   : > { %v398_v25 = vsel %vm1777_vm4, %v393_v3, %v397_v45  ;;  %v1031_v31 = vrot.slane %v1029_v8, 4  ;;  %v1032_v19 = vshll.u32 %v1869_v50, 16  ;;  %v1038_v35 = vshll.u32 %v953_v7, 16 }
  0x36   : > { %1525 = vmatmul.mubr.msk.bf16.vlgmr.msra.gmra.mrb[0].mxu0 %vm428_vm1, %v1431_v11  ;;  %v407_v32 = vrot.slane %v406_v10, 4  ;;  %v1021_v34 = vor.u32 %v1020_v13, %v1017_v12  ;;  %v1402_v39 = vcombine.low %v1717_v23, %v1722_v26  ;;  %v1043_v44 = vshrl.u32 %v1879_v17, 16  ;;  %v611_v10 = vld [vmem:[%s1678_s7 + $0x4] sm:$0x1] }
  0x37   : > { %v1034_v43 = vrot.slane %v1032_v19, 5  ;;  %v1046_v45 = vshll.u32 %v1879_v17, 16  ;;  %v1052_v48 = vshll.u32 %v955_v18, 16  ;;  %1533 = vmatpush3.bf16.msra.mxu0 %v1725_v27  ;;  %v1040_v49 = vrot.slane %v1038_v35, 5 }
  0x38   : > { %v412_v54 = vsel %vm1777_vm4, %v407_v32, %v411_v6  ;;  %v1022_v56 = vrot.slane %v1021_v34, 4  ;;  %v1057_v62 = vshrl.u32 %v1886_v24, 16  ;;  %v1045_v23 = vrot.slane %v1043_v44, 4  ;;  %v615_v44 = vld [vmem:[%s1678_s7 + $0x14] sm:$0x1] }
  0x39   : > { %v1397_v63 = vcombine.low %v398_v25, %v412_v54  ;;  %v1035_v14 = vor.u32 %v1034_v43, %v1031_v31  ;;  %v1048_v26 = vrot.slane %v1046_v45, 5  ;;  %v686_v1 = vshll.u32 %v1711_v21, 16  ;;  %v613_v31 = vld [vmem:[%s1678_s7 + $0xc] sm:$0x1] }
  0x3a   : > { %v697_v2 = vshrl.u32 %v1714_v22, 16  ;;  %v1059_v3 = vrot.slane %v1057_v62, 4  ;;  %v1060_v27 = vshll.u32 %v1886_v24, 16  ;;  %v1027_v6 = vsel %vm1777_vm4, %v1022_v56, %v1026_v30  ;;  %v617_v56 = vld [vmem:[%s1678_s7 + $0x1c] sm:$0x1] }
  0x3b   : > { %1489 = vmatmul.mubr.msk.bf16.gmra.mrb[4].mxu1 %vm428_vm1, %v1397_v63  ;;  %v1036_v7 = vrot.slane %v1035_v14, 4  ;;  %v1049_v8 = vor.u32 %v1048_v26, %v1045_v23  ;;  %v1066_v11 = vshll.u32 %v957_v61, 16  ;;  %v634_v12 = vrot.slane %v633_v52, 4 }
  0x3c   : > { %v700_v13 = vshll.u32 %v1714_v22, 16  ;;  %1494 = vmatprep.mubr.msk.bf16.mxu1 %vm428_vm1, %v1402_v39  ;;  %v1054_v18 = vrot.slane %v1052_v48, 5  ;;  %v1062_v25 = vrot.slane %v1060_v27, 5  ;;  %v648_v19 = vrot.slane %v647_v58, 4 }
  0x3d   : > { %v685_v30 = vrot.slane %v683_v0, 4  ;;  %v1041_v32 = vsel %vm1777_vm4, %v1036_v7, %v1040_v49  ;;  %v1050_v28 = vrot.slane %v1049_v8, 4  ;;  %v1068_v22 = vrot.slane %v1066_v11, 5 }
  0x3e   : > { %v1432_v29 = vcombine.low %v1027_v6, %v1041_v32  ;;  %v1063_v52 = vor.u32 %v1062_v25, %v1059_v3  ;;  %v636_v34 = vshll.u32 %v611_v10, 16  ;;  %v688_v35 = vrot.slane %v686_v1, 5 }
  0x3f   : > { %v699_v39 = vrot.slane %v697_v2, 4  ;;  %v1403_v33 = vcombine.low %v1763_v51, %v1771_v57  ;;  %v650_v37 = vshll.u32 %v613_v31, 16  ;;  %v702_v21 = vrot.slane %v700_v13, 5  ;;  %v619_v51 = vld [vmem:[%s1678_s7 + $0x24] sm:$0x1] }
  0x40   : > { %1528 = vmatprep.mubr.msk.bf16.mxu0 %vm428_vm1, %v1432_v29  ;;  %v1055_v58 = vsel %vm1777_vm4, %v1050_v28, %v1054_v18  ;;  %v1064_v0 = vrot.slane %v1063_v52, 4  ;;  %v1404_v43 = vcombine.low %v1808_v40, %v1814_v60  ;;  %v661_v45 = vor.u32 %v1759_v47, %v1747_v42  ;;  %v621_v40 = vld [vmem:[%s1678_s7 + $0x2c] sm:$0x1] }
  0x41   : > { %v638_v48 = vrot.slane %v636_v34, 5  ;;  %v652_v54 = vrot.slane %v650_v37, 5  ;;  %v675_v57 = vor.u32 %v1790_v5, %v1767_v53  ;;  %v711_v49 = vshrl.u32 %v1745_v41, 16 }
  0x42   : > { %v1069_v61 = vsel %vm1777_vm4, %v1064_v0, %v1068_v22  ;;  %v1438_v62 = vcombine.low %v1788_v4, %v1799_v16  ;;  %v714_v60 = vshll.u32 %v1745_v41, 16  ;;  %v725_v42 = vshrl.u32 %v1751_v46, 16 }
  0x43   : > { %v1433_v47 = vcombine.low %v1055_v58, %v1069_v61  ;;  %1495 = vmatmul.mubr.msk.bf16.vlgmr.msra.gmra.mrb[0].mxu1 %vm428_vm1, %v1403_v33  ;;  %v664_v63 = vshll.u32 %v615_v44, 16  ;;  %v728_v14 = vshll.u32 %v1751_v46, 16  ;;  %v678_v53 = vshll.u32 %v617_v56, 16 }
  0x44   : > { %1503 = vmatpush3.bf16.msra.mxu1 %v1708_v20  ;;  %1498 = vmatprep.mubr.msk.bf16.mxu1 %vm428_vm1, %v1404_v43  ;;  %v689_v5 = vor.u32 %v688_v35, %v685_v30  ;;  %v692_v23 = vshll.u32 %v619_v51, 16  ;;  %v639_v41 = vsel %vm1777_vm4, %v634_v12, %v638_v48  ;;  %v653_v4 = vsel %vm1777_vm4, %v648_v19, %v652_v54  ;;  %v623_v12 = vld [vmem:[%s1678_s7 + $0x34] sm:$0x1]  ;;  %v625_v19 = vld [vmem:[%s1678_s7 + $0x3c] sm:$0x1] }
  0x45   : > { %1529 = vmatmul.mubr.msk.bf16.gmra.mrb[4].mxu0 %vm428_vm1, %v1433_v47  ;;  %v703_v16 = vor.u32 %v702_v21, %v699_v39  ;;  %v706_v26 = vshll.u32 %v621_v40, 16  ;;  %v662_v1 = vrot.slane %v661_v45, 4  ;;  %v676_v46 = vrot.slane %v675_v57, 4  ;;  %v1446_v45 = vld [vmem:[%s2004_s4] ss:$0 sm:$0xff] }
  0x46   : > { %v713_v20 = vrot.slane %v711_v49, 4  ;;  %1534 = vmatprep.mubr.msk.bf16.mxu0 %vm428_vm1, %v1438_v62  ;;  %v716_v2 = vrot.slane %v714_v60, 5  ;;  %v727_v3 = vrot.slane %v725_v42, 4  ;;  %v1405_v27 = vcombine.low %v1842_v55, %v1853_v9 }
  0x47   : > { %v666_v6 = vrot.slane %v664_v63, 5  ;;  %v730_v7 = vrot.slane %v728_v14, 5  ;;  %v1439_v8 = vcombine.low %v1825_v15, %v1833_v38  ;;  %v1412_v11 = vcombine.low %v639_v41, %v653_v4 }
  0x48   : > { %v680_v10 = vrot.slane %v678_v53, 5  ;;  %v690_v13 = vrot.slane %v689_v5, 4  ;;  %v694_v18 = vrot.slane %v692_v23, 5  ;;  %v704_v25 = vrot.slane %v703_v16, 4 }
  0x49   : > { %v708_v31 = vrot.slane %v706_v26, 5  ;;  %v1440_v30 = vcombine.low %v1862_v36, %v1869_v50  ;;  %v667_v55 = vsel %vm1777_vm4, %v662_v1, %v666_v6  ;;  %v717_v9 = vor.u32 %v716_v2, %v713_v20 }
  0x4a   : > { %v681_v15 = vsel %vm1777_vm4, %v676_v46, %v680_v10  ;;  %v720_v38 = vshll.u32 %v623_v12, 16  ;;  %v731_v32 = vor.u32 %v730_v7, %v727_v3  ;;  %v734_v28 = vshll.u32 %v625_v19, 16 }
  0x4b   : > { %1499 = vmatmul.mubr.msk.bf16.gmra.mrb[4].mxu1 %vm428_vm1, %v1405_v27  ;;  %v695_v29 = vsel %vm1777_vm4, %v690_v13, %v694_v18  ;;  %v709_v36 = vsel %vm1777_vm4, %v704_v25, %v708_v31  ;;  %v1413_v50 = vcombine.low %v667_v55, %v681_v15  ;;  %v718_v52 = vrot.slane %v717_v9, 4 }
  0x4c   : > { %1504 = vmatprep.mubr.msk.bf16.mxu1 %vm428_vm1, %v1412_v11  ;;  %v1414_v22 = vcombine.low %v695_v29, %v709_v36  ;;  %v722_v34 = vrot.slane %v720_v38, 5  ;;  %v732_v35 = vrot.slane %v731_v32, 4  ;;  %v736_v39 = vrot.slane %v734_v28, 5 }
  0x4d   : > { %1535 = vmatmul.mubr.msk.bf16.vlgmr.msra.gmra.mrb[0].mxu0 %vm428_vm1, %v1439_v8  ;;  %v1441_v33 = vcombine.low %v1879_v17, %v1886_v24 }
  0x4e   : > { %1538 = vmatprep.mubr.msk.bf16.mxu0 %vm428_vm1, %v1440_v30  ;;  %v723_v37 = vsel %vm1777_vm4, %v718_v52, %v722_v34  ;;  %v737_v21 = vsel %vm1777_vm4, %v732_v35, %v736_v39 }
  0x4f   : > { %v1415_v58 = vcombine.low %v723_v37, %v737_v21 }
  0x53   : > { %1505 = vmatmul.mubr.msk.bf16.vlgmr.msra.gmra.mrb[0].mxu1 %vm428_vm1, %v1413_v50 }
  0x54   : > { %1508 = vmatprep.mubr.msk.bf16.mxu1 %vm428_vm1, %v1414_v22 }
  0x55   : > { %1539 = vmatmul.mubr.msk.bf16.gmra.mrb[4].mxu0 %vm428_vm1, %v1441_v33 }
  0x5b   : > { %1509 = vmatmul.mubr.msk.bf16.gmra.mrb[4].mxu1 %vm428_vm1, %v1415_v58 }
 0x120   : > { %v1536_v0 = vpop.f32.mrb[0].mxu0 }
 0x121   : > { %v1235_v43 = vpop.f32.mrb[1].mxu0 }
 0x122   : > { %v1537_v44 = vpop.f32.mrb[2].mxu0 }
 0x123   : > { %v1238_v17 = vpop.f32.mrb[3].mxu0 }
 0x126   : > { %v1506_v24 = vpop.f32.mrb[0].mxu1 }
 0x127   : > { %v1542_v48 = vadd.f32 %v1536_v0, %v1506_v24  ;;  %v803_v54 = vpop.f32.mrb[1].mxu1 }
 0x128   : > { %v1540_v56 = vpop.f32.mrb[4].mxu0  ;;  %v1543_v59 = vadd.f32 %v1235_v43, %v803_v54  ;;  %v1507_v51 = vpop.f32.mrb[2].mxu1 }
 0x129   : > { %v1283_v57 = vadd.f32 %v1542_v48, %v1446_v45  ;;  %v1251_v49 = vpop.f32.mrb[5].mxu0  ;;  %v1544_v61 = vadd.f32 %v1537_v44, %v1507_v51  ;;  %v806_v62 = vpop.f32.mrb[3].mxu1 }
 0x12a   : > { %v1281_v40 = vadd.f32 %v1543_v59, %v1446_v45  ;;  %v1541_v60 = vpop.f32.mrb[6].mxu0  ;;  %v1545_v42 = vadd.f32 %v1238_v17, %v806_v62 }
 0x12b   : > { %1291 = vst [vmem:[%s1987_s23 + $0x10] sm:$0xff] %v1283_v57  ;;  %v1284_v47 = vadd.f32 %v1544_v61, %v1446_v45  ;;  %v1254_v63 = vpop.f32.mrb[7].mxu0 }
 0x12c   : > { %1289 = vst [vmem:[%s1987_s23] sm:$0xff] %v1281_v40  ;;  %v1282_v14 = vadd.f32 %v1545_v42, %v1446_v45 }
 0x12d   : > { %1292 = vst [vmem:[%s1987_s23 + $0x18] sm:$0xff] %v1284_v47 }
 0x12e   : > { %1290 = vst [vmem:[%s1987_s23 + $0x8] sm:$0xff] %v1282_v14  ;;  %v1510_v53 = vpop.f32.mrb[4].mxu1 }
 0x12f   : > { %v1546_v5 = vadd.f32 %v1540_v56, %v1510_v53  ;;  %v819_v23 = vpop.f32.mrb[5].mxu1 }
 0x130   : > { %v1547_v41 = vadd.f32 %v1251_v49, %v819_v23  ;;  %v1511_v4 = vpop.f32.mrb[6].mxu1 }
 0x131   : > { %v1287_v16 = vadd.f32 %v1546_v5, %v1446_v45  ;;  %v1548_v26 = vadd.f32 %v1541_v60, %v1511_v4  ;;  %v822_v1 = vpop.f32.mrb[7].mxu1 }
 0x132   : > { %v1285_v46 = vadd.f32 %v1547_v41, %v1446_v45  ;;  %v1549_v20 = vadd.f32 %v1254_v63, %v822_v1 }
 0x133   : > { %1295 = vst [vmem:[%s1987_s23 + $0x30] sm:$0xff] %v1287_v16  ;;  %v1288_v2 = vadd.f32 %v1548_v26, %v1446_v45 }
 0x134   : > { %1293 = vst [vmem:[%s1987_s23 + $0x20] sm:$0xff] %v1285_v46  ;;  %v1286_v3 = vadd.f32 %v1549_v20, %v1446_v45 }
 0x135   : > { %1296 = vst [vmem:[%s1987_s23 + $0x38] sm:$0xff] %v1288_v2 }
 0x136   : > { %1294 = vst [vmem:[%s1987_s23 + $0x28] sm:$0xff] %v1286_v3 }
 0x137 PF: > { %s15_s18 = sadd.s32 1, %s1614_s18  }
 0x138   : > { %p12_p4 = scmp.ge.s32.totalorder %s15_s18, 4  }
 0x13a   :  { %14 = sbr.rel (!%p12_p4) target bundleno = 1 (0x1), region = 81 }

</bundles_post_ra>
